<compile_context>
chip_gen: v6e
topology: v6e:2x2x1
jax: 0.10.0
libtpu: 0.0.40
codegen_flags: <defaults>
</compile_context>

<pallas_src>
import functools

import jax
import jax.numpy as jnp
from jax.experimental import pallas as pl
from jax.experimental.pallas import tpu as pltpu

LANES = 128
SUBLANES = 8
CHUNK_ROWS = 512            # in-kernel accumulation granule (multiple of 8)
MIN_KERNEL_ELEMS = 1 << 20  # below this, plain XLA wins (launch overhead)


def _round_up(x, m):
    return ((x + m - 1) // m) * m


def _chip_config():
    """Per-generation tile / split / VMEM-limit defaults."""
    kind = ""
    try:
        kind = jax.devices()[0].device_kind.lower()
    except Exception:
        pass
    if "v7" in kind or "7x" in kind:
        # 2 TensorCores, ~3.2 TB/s HBM: big steps, split across cores.
        return dict(target_bytes=4 << 20, num_splits=2, vmem_limit=48 << 20)
    if "v6" in kind:
        return dict(target_bytes=2 << 20, num_splits=1, vmem_limit=32 << 20)
    # v5e / unknown: 2 MiB steps; raise scoped VMEM past the 16 MiB default.
    return dict(target_bytes=2 << 20, num_splits=1, vmem_limit=32 << 20)


def _mse_partial_sum_kernel(p_ref, t_ref, out_ref, acc_ref, *,
                            rows, row_tile, chunk_rows,
                            tiles_per_split, total_tiles, mask_needed):
    c = pl.program_id(0)          # split (core) index
    i = pl.program_id(1)          # tile index within this split

    @pl.when(i == 0)
    def _():
        acc_ref[...] = jnp.zeros_like(acc_ref)

    logical_tile = c * tiles_per_split + i
    tile_row0 = logical_tile * row_tile

    n_chunks, tail = divmod(row_tile, chunk_rows)

    def accumulate(masked):
        def do_chunk(start, size):          # start/size are static Python ints
            p_blk = p_ref[pl.ds(start, size), :].astype(jnp.float32)
            t_blk = t_ref[pl.ds(start, size), :].astype(jnp.float32)
            d = p_blk - t_blk
            sq = d * d
            if masked:
                # True select: garbage (possibly NaN/Inf) rows past the real
                # extent, or a whole clamped duplicate tile, contribute 0.
                row_ids = jax.lax.broadcasted_iota(jnp.int32, (size, LANES), 0)
                valid = (tile_row0 + start + row_ids) < rows
                sq = jnp.where(valid, sq, 0.0)
            # Reduce sublane-groups into the single-vreg accumulator.
            acc_ref[...] += sq.reshape(-1, SUBLANES, LANES).sum(axis=0)

        for j in range(n_chunks):
            do_chunk(j * chunk_rows, chunk_rows)
        if tail:
            do_chunk(n_chunks * chunk_rows, tail)

    if mask_needed:
        # Only the last real tile and clamped duplicate tiles can overrun.
        boundary = logical_tile >= (total_tiles - 1)

        @pl.when(boundary)
        def _():
            accumulate(masked=True)

        @pl.when(jnp.logical_not(boundary))
        def _():
            accumulate(masked=False)
    else:
        accumulate(masked=False)

    @pl.when(i == pl.num_programs(1) - 1)
    def _():
        out_ref[0, 0] = jnp.sum(acc_ref[...])


def mse_loss_pallas(predictions, targets, *,
                    min_kernel_elems=MIN_KERNEL_ELEMS,
                    row_tile=None, num_splits=None):
    """mean((predictions - targets) ** 2), i.e. nn.MSELoss(reduction='mean')."""
    assert predictions.shape == targets.shape, (predictions.shape, targets.shape)
    n = predictions.size
    if n == 0:
        return jnp.float32(jnp.nan)

    # Small-input fast path: fused XLA elementwise+reduce beats kernel launch.
    if n < min_kernel_elems:
        d = predictions.astype(jnp.float32) - targets.astype(jnp.float32)
        return jnp.mean(d * d)

    cfg = _chip_config()
    itemsize = jnp.dtype(predictions.dtype).itemsize

    p = predictions.reshape(-1)
    t = targets.reshape(-1)

    # Lane alignment only: pad to a multiple of 128 elements (zeros add 0 to
    # the sum).  Ragged row tiles are handled by in-kernel masking.
    rem = n % LANES
    if rem:
        p = jnp.pad(p, (0, LANES - rem))
        t = jnp.pad(t, (0, LANES - rem))
    rows = pl.cdiv(n, LANES)
    p2 = p.reshape(rows, LANES)
    t2 = t.reshape(rows, LANES)

    # Row tile: bytes/step kept roughly constant across dtypes, multiple of the
    # chunk (hence of 8 sublanes); clamped to the (8-rounded) row extent.
    if row_tile is None:
        target_rows = max(CHUNK_ROWS, cfg["target_bytes"] // (LANES * itemsize))
        target_rows = (target_rows // CHUNK_ROWS) * CHUNK_ROWS
        row_tile = min(target_rows, _round_up(rows, SUBLANES))
    else:
        row_tile = max(SUBLANES, (int(row_tile) // SUBLANES) * SUBLANES)
        row_tile = min(row_tile, _round_up(rows, SUBLANES))

    total_tiles = pl.cdiv(rows, row_tile)
    n_splits = cfg["num_splits"] if num_splits is None else int(num_splits)
    n_splits = max(1, min(n_splits, total_tiles))
    tiles_per_split = pl.cdiv(total_tiles, n_splits)
    mask_needed = (n_splits * tiles_per_split * row_tile) != rows

    def in_index_map(c, i):
        # Clamp so an uneven split never issues an out-of-range block DMA;
        # the duplicated tile is masked to zero inside the kernel.
        return (jnp.minimum(c * tiles_per_split + i, total_tiles - 1), 0)

    kernel = functools.partial(
        _mse_partial_sum_kernel,
        rows=rows,
        row_tile=row_tile,
        chunk_rows=min(CHUNK_ROWS, row_tile),
        tiles_per_split=tiles_per_split,
        total_tiles=total_tiles,
        mask_needed=mask_needed,
    )

    partial_sums = pl.pallas_call(
        kernel,
        out_shape=jax.ShapeDtypeStruct((n_splits, 1), jnp.float32),
        grid_spec=pltpu.PrefetchScalarGridSpec(
            num_scalar_prefetch=0,
            grid=(n_splits, tiles_per_split),
            in_specs=[
                pl.BlockSpec((row_tile, LANES), in_index_map),
                pl.BlockSpec((row_tile, LANES), in_index_map),
            ],
            out_specs=pl.BlockSpec((1, 1), lambda c, i: (c, 0),
                                   memory_space=pltpu.SMEM),
            scratch_shapes=[pltpu.VMEM((SUBLANES, LANES), jnp.float32)],
        ),
        compiler_params=pltpu.CompilerParams(
            dimension_semantics=("parallel", "arbitrary"),
            vmem_limit_bytes=cfg["vmem_limit"]),
    )(p2, t2)

    return jnp.sum(partial_sums) / jnp.float32(n)


class MSELossNoContrastive:
    """JAX/Pallas equivalent of the PyTorch module (no parameters)."""

    def __call__(self, predictions, targets):
        return mse_loss_pallas(predictions, targets)


if __name__ == "__main__":
    key = jax.random.PRNGKey(0)
    k1, k2 = jax.random.split(key)

    loss_fn = MSELossNoContrastive()

    # 1) Small regression-style NCHW inputs -> exercises the fast path.
    shape = (2, 4, 16, 16)
    predictions = jax.random.normal(k1, shape, dtype=jnp.float32)
    targets = jax.random.normal(k2, shape, dtype=jnp.float32)
    loss = loss_fn(predictions, targets)
    jax.block_until_ready(loss)
    ref = jnp.mean((predictions - targets) ** 2)
    assert jnp.allclose(loss, ref, rtol=1e-6, atol=1e-6), (loss, ref)

    # 2) Same small inputs, kernel path forced (single full-extent block).
    loss_k = mse_loss_pallas(predictions, targets, min_kernel_elems=0)
    jax.block_until_ready(loss_k)
    assert jnp.allclose(loss_k, ref, rtol=1e-6, atol=1e-6), (loss_k, ref)

    # 3) Medium shape, forced multi-tile + 2-way split + masked ragged tail
    #    and clamped duplicate tile.
    big_shape = (2, 4, 128, 130)   # 133120 elems -> 1040 rows
    bp = jax.random.normal(k1, big_shape, dtype=jnp.float32)
    bt = jax.random.normal(k2, big_shape, dtype=jnp.float32)
    big_ref = jnp.mean((bp - bt) ** 2)
    big_loss = mse_loss_pallas(bp, bt, min_kernel_elems=0,
                               row_tile=256, num_splits=2)
    jax.block_until_ready(big_loss)
    assert jnp.allclose(big_loss, big_ref, rtol=1e-5, atol=1e-6), (big_loss, big_ref)

    # 4) Medium shape, forced kernel with default (chip-aware) tiling to
    #    exercise the multi-chunk accumulation loop.
    big_loss2 = mse_loss_pallas(bp, bt, min_kernel_elems=0)
    jax.block_until_ready(big_loss2)
    assert jnp.allclose(big_loss2, big_ref, rtol=1e-5, atol=1e-6), (big_loss2, big_ref)

    print("KERNEL_OK")
</pallas_src>

<mosaic_0001>
module attributes {stable_mosaic.version = 11 : i64} {
  func.func @_mse_partial_sum_kernel(%arg0: i32, %arg1: i32, %arg2: memref<16x128xf32, #tpu.memory_space<vmem>>, %arg3: memref<16x128xf32, #tpu.memory_space<vmem>>, %arg4: memref<1x1xf32, #tpu.memory_space<smem>>, %arg5: memref<8x128xf32, #tpu.memory_space<vmem>>) attributes {dimension_semantics = [#tpu.dimension_semantics<parallel>, #tpu.dimension_semantics<arbitrary>], iteration_bounds = array<i64: 1, 1>, scalar_prefetch = 0 : i64, scratch_operands = 1 : i64, tpu.core_type = #tpu.core_type<tc>, window_params = [{transform_indices = @transform_0, window_bounds = array<i64: 16, 128>}, {transform_indices = @transform_1, window_bounds = array<i64: 16, 128>}, {transform_indices = @transform_2, window_bounds = array<i64: 1, 1>}]} {
    %c0_i32 = arith.constant 0 : i32
    %0 = arith.cmpi eq, %arg1, %c0_i32 : i32
    %1 = arith.extui %0 : i1 to i32
    %c0_i32_0 = arith.constant 0 : i32
    %2 = arith.cmpi ne, %1, %c0_i32_0 : i32
    scf.if %2 {
      %cst_10 = arith.constant 0.000000e+00 : f32
      %15 = vector.broadcast %cst_10 : f32 to vector<8x128xf32>
      %c0_11 = arith.constant 0 : index
      %c0_12 = arith.constant 0 : index
      %16 = vector.load %arg5[%c0_11, %c0_12] : memref<8x128xf32, #tpu.memory_space<vmem>>, vector<8x128xf32>
      tpu.vector_store %arg5[%c0_11, %c0_12], %15 {strides = array<i32>} : memref<8x128xf32, #tpu.memory_space<vmem>>, vector<8x128xf32>,
    } else {
    }
    %c0 = arith.constant 0 : index
    %c0_1 = arith.constant 0 : index
    %3 = vector.load %arg2[%c0, %c0_1] : memref<16x128xf32, #tpu.memory_space<vmem>>, vector<16x128xf32>
    %c0_2 = arith.constant 0 : index
    %c0_3 = arith.constant 0 : index
    %4 = vector.load %arg3[%c0_2, %c0_3] : memref<16x128xf32, #tpu.memory_space<vmem>>, vector<16x128xf32>
    %5 = arith.subf %3, %4 : vector<16x128xf32>
    %6 = arith.mulf %5, %5 : vector<16x128xf32>
    %c0_4 = arith.constant 0 : index
    %c0_5 = arith.constant 0 : index
    %7 = vector.load %arg5[%c0_4, %c0_5] : memref<8x128xf32, #tpu.memory_space<vmem>>, vector<8x128xf32>
    %8 = vector.shape_cast %6 : vector<16x128xf32> to vector<2x8x128xf32>
    %cst = arith.constant dense<0.000000e+00> : vector<8x128xf32>
    %9 = vector.multi_reduction <add>, %8, %cst [0] : vector<2x8x128xf32> to vector<8x128xf32>
    %10 = arith.addf %7, %9 : vector<8x128xf32>
    %c0_6 = arith.constant 0 : index
    %c0_7 = arith.constant 0 : index
    %11 = vector.load %arg5[%c0_6, %c0_7] : memref<8x128xf32, #tpu.memory_space<vmem>>, vector<8x128xf32>
    tpu.vector_store %arg5[%c0_6, %c0_7], %10 {strides = array<i32>} : memref<8x128xf32, #tpu.memory_space<vmem>>, vector<8x128xf32>,
    %c0_i32_8 = arith.constant 0 : i32
    %12 = arith.cmpi eq, %arg1, %c0_i32_8 : i32
    %13 = arith.extui %12 : i1 to i32
    %c0_i32_9 = arith.constant 0 : i32
    %14 = arith.cmpi ne, %13, %c0_i32_9 : i32
    scf.if %14 {
      %c0_10 = arith.constant 0 : index
      %c0_11 = arith.constant 0 : index
      %15 = vector.load %arg5[%c0_10, %c0_11] : memref<8x128xf32, #tpu.memory_space<vmem>>, vector<8x128xf32>
      %16 = vector.shape_cast %15 : vector<8x128xf32> to vector<1x8x128xf32>
      %cst_12 = arith.constant dense<0.000000e+00> : vector<1xf32>
      %17 = vector.multi_reduction <add>, %16, %cst_12 [1, 2] : vector<1x8x128xf32> to vector<1xf32>
      %18 = vector.shape_cast %17 : vector<1xf32> to vector<1x1x1xf32>
      %19 = vector.extract %18[0, 0, 0] : f32 from vector<1x1x1xf32>
      %c0_13 = arith.constant 0 : index
      %c0_14 = arith.constant 0 : index
      %20 = memref.load %arg4[%c0_13, %c0_14] : memref<1x1xf32, #tpu.memory_space<smem>>
      memref.store %19, %arg4[%c0_13, %c0_14] : memref<1x1xf32, #tpu.memory_space<smem>>
    } else {
    }
    return
  }
  func.func @transform_0(%arg0: i32, %arg1: i32) -> (i32, i32) {
    %c1_i32 = arith.constant 1 : i32
    %0 = arith.muli %arg0, %c1_i32 : i32
    %1 = arith.addi %0, %arg1 : i32
    %c0_i32 = arith.constant 0 : i32
    %2 = arith.minsi %1, %c0_i32 : i32
    %c0_i32_0 = arith.constant 0 : i32
    %c0_i32_1 = arith.constant 0 : i32
    return %2, %c0_i32_0 : i32, i32
  }
  func.func @transform_1(%arg0: i32, %arg1: i32) -> (i32, i32) {
    %c1_i32 = arith.constant 1 : i32
    %0 = arith.muli %arg0, %c1_i32 : i32
    %1 = arith.addi %0, %arg1 : i32
    %c0_i32 = arith.constant 0 : i32
    %2 = arith.minsi %1, %c0_i32 : i32
    %c0_i32_0 = arith.constant 0 : i32
    %c0_i32_1 = arith.constant 0 : i32
    return %2, %c0_i32_0 : i32, i32
  }
  func.func @transform_2(%arg0: i32, %arg1: i32) -> (i32, i32) {
    %c0_i32 = arith.constant 0 : i32
    %c0_i32_0 = arith.constant 0 : i32
    return %arg0, %c0_i32 : i32, i32
  }
}

</mosaic_0001>

<bundles_post_ra>
// kernel: tpu_custom_call.1
= control target key start
LH: loop header
LB: loop body
LE: loop exit
PB: predicated region body
PF: predicated region fallthrough
CT: control target
= control target key end

     0   :  { %7 = vsyncpa [#allocation4], 0  ;;  %s201_s0 = inlined_call_operand.hbm [shape: f32[16,128], index: 0, kind: input, shape index: {}]   ;;  %s202_s1 = inlined_call_operand.hbm [shape: f32[16,128], index: 1, kind: input, shape index: {}]   ;;  %s203_s2 = inlined_call_operand.hbm [shape: f32[1,1], index: 2, kind: output, shape index: {}]  }
   0x1   :  { %8 = vsyncpa [#allocation7], 0 }
   0x2   :  { %9 = vsyncpa [#allocation5], 0  ;;  %s172_s9 = smov [#allocation3]  }
   0x3   :  { %s21_s10 = sshll.u32 %s172_s9, 4  ;;  %s22_s10 = int_to_ptr.vmem [resolvable:$true] %s21_s10 }
   0x4   :  { %s126_s11 = scalar_lea.vmem %s22_s10, 256  ;;  %p131_p1 = scmp.lt.s32.totalorder %s22_s10, %s22_s10 }
   0x5   :  { %p127_p0 = scmp.ne.s32.totalorder %s22_s10, %s126_s11  ;;  %p132_p2 = scmp.lt.s32.totalorder %s126_s11, %s126_s11 }
   0x7   :  { %p133_p3 = por %p132_p2, %p131_p1 }
   0x9   :  { %p134_p4 = pnand %p133_p3, %p127_p0 }
   0xb   :  { %137 = shalt.err (!%p134_p4)
}
   0xc   :  { %s173_s12 = smov 128   ;;  %s174_s13 = smov 8  }
   0xd   :  { %27 = dma.hbm_to_vmem [thread:$0]  %s201_s0, 256, %s22_s10, [#allocation4], %s173_s12, %s173_s12, %s174_s13  }
   0xe   :  { %s175_s16 = smov [#allocation6]  }
   0xf   :  { %s39_s17 = sshll.u32 %s175_s16, 4  ;;  %s40_s17 = int_to_ptr.vmem [resolvable:$true] %s39_s17 }
  0x10   :  { %s146_s18 = scalar_lea.vmem %s40_s17, 256  ;;  %p151_p6 = scmp.lt.s32.totalorder %s40_s17, %s40_s17 }
  0x11   :  { %p147_p5 = scmp.ne.s32.totalorder %s40_s17, %s146_s18  ;;  %p152_p7 = scmp.lt.s32.totalorder %s146_s18, %s146_s18 }
  0x13   :  { %p153_p8 = por %p152_p7, %p151_p6 }
  0x15   :  { %p154_p9 = pnand %p153_p8, %p147_p5 }
  0x17   :  { %157 = shalt.err (!%p154_p9)
}
  0x18   :  { %45 = dma.hbm_to_vmem [thread:$0]  %s202_s1, 256, %s40_s17, [#allocation7], %s173_s12, %s173_s12, %s174_s13  }
  0x19   :  { %166 = dma.done.wait [#allocation4], 256  }
  0x1a   :  { %167 = vsyncadd [#allocation4], 4294967040 }
  0x1b   :  { %168 = dma.done.wait [#allocation7], 256  }
  0x1c   :  { %169 = vsyncadd [#allocation7], 4294967040  ;;  %v65_v0 = vld [vmem:[#allocation3] sm:$0xff]  ;;  %v66_v1 = vld [vmem:[#allocation3 + $0x8] sm:$0xff]  ;;  %s176_s1 = smov [#allocation8]  }
  0x1d   :  { %v67_v2 = vld [vmem:[#allocation6] sm:$0xff]  ;;  %v68_v3 = vld [vmem:[#allocation6 + $0x8] sm:$0xff] }
  0x1e   :  { %v69_v4 = vsub.f32 %v65_v0, %v67_v2  ;;  %v70_v5 = vsub.f32 %v66_v1, %v68_v3 }
  0x20   :  { %v71_v6 = vmul.f32 %v69_v4, %v69_v4  ;;  %v72_v7 = vmul.f32 %v70_v5, %v70_v5 }
  0x22   :  { %v74_v8 = vadd.f32 %v72_v7, %v71_v6 }
  0x24   :  { %81 = vadd.xlane.f32.xlu0 %v74_v8 }
  0xad   :  { %v82_v9 = vpop.xlane.xlu0 %81 }
  0xae   :  { %v83_v10 = vrot.slane %v82_v9, 4 }
  0xb0   :  { %v84_v11 = vadd.f32 %v83_v10, %v82_v9 }
  0xb2   :  { %v85_v12 = vrot.slane %v84_v11, 2 }
  0xb4   :  { %v86_v13 = vadd.f32 %v85_v12, %v84_v11 }
  0xb6   :  { %v87_v14 = vrot.slane %v86_v13, 1 }
  0xb8   :  { %v88_v15 = vadd.f32 %v87_v14, %v86_v13 }
  0xba   :  { %111 = vpush %v88_v15 }
  0xeb   :  { %s112_s0 = spop %111 }
  0xec   :  { %91 = sst [smem:[#allocation8]] %s112_s0 }
  0xed   :  { %99 = dma.smem_to_hbm %s176_s1, 16, %s203_s2, [#allocation5]  }
  0xee   :  { %170 = dma.done.wait [#allocation5], 16  }
  0xef   :  { %171 = vsyncadd [#allocation5], 4294967280 }
  0xf0   :  { %103 = sfence }
  0xf1   :  { %104 = vsyncpa [#allocation4], 1 }
  0xf2   :  { %105 = vsyncpa [#allocation7], 1 }
  0xf3   :  { %106 = vsyncpa [#allocation5], 1 }

</bundles_post_ra>
